<compile_context>
chip_gen: v7x
topology: tpu7x:2x2x1
jax: 0.10.0
libtpu: 0.0.40
codegen_flags: <defaults>
</compile_context>

<pallas_src>
import jax
import jax.numpy as jnp
from jax.experimental import pallas as pl
from jax.experimental.pallas import tpu as pltpu


def _sigmoid_kernel(x_ref, o_ref):
    x = x_ref[...]
    # sigmoid(x) = 0.5 * (tanh(0.5 * x) + 1)
    o_ref[...] = (0.5 * (jnp.tanh(0.5 * x) + 1.0)).astype(o_ref.dtype)


def _hw_config():
    """Per-generation (block_bytes, vmem_limit_bytes_or_None, num_tensorcores)."""
    kind = ""
    try:
        kind = jax.devices()[0].device_kind.lower()
    except Exception:
        pass
    if "v7" in kind:
        # v7x: ~3.2 TB/s HBM per TC, 64 MiB physical VMEM, 2 TCs/chip.
        # 8 MiB blocks -> 32 MiB of in+out double buffers; raise the scoped
        # limit to 48 MiB and leave ~16 MiB headroom for compiler scratch.
        return 8 << 20, 48 << 20, 2
    if "v6" in kind:
        # v6e: ~1.4 TB/s HBM, 128 MiB physical VMEM (32 MiB scoped default).
        return 8 << 20, 48 << 20, 1
    # v5e / unknown: ~0.82 TB/s HBM, 16 MiB scoped VMEM default.  2 MiB blocks
    # (8 MiB of buffers) fit without touching the limit, and the fixed
    # per-step overhead is already <8% of a ~5 us DMA step.
    return 2 << 20, None, 1


def _pick_lanes(n):
    # Widest lane-dense last dim (multiple of 128) that divides n.
    for cand in (2048, 1024, 512, 256, 128):
        if n % cand == 0:
            return cand
    return None


def _pick_tile_rows(rows_total, bytes_per_row, block_bytes, sublane, num_tc):
    target = max(1, block_bytes // bytes_per_row)
    if num_tc > 1:
        # Keep at least `num_tc` grid steps so CORE_PARALLEL can shard them.
        target = min(target, max(1, rows_total // num_tc))
    if rows_total <= target:
        return rows_total                      # single full-extent block (legal)
    # Prefer a sublane-aligned divisor of rows_total within [target/2, target]
    # so the last grid block is not ragged (all stores unmasked vst).
    aligned_target = max(sublane, (target // sublane) * sublane)
    lo = max(sublane, aligned_target // 2)
    d = aligned_target
    while d >= lo:
        if rows_total % d == 0:
            return d
        d -= sublane
    # Fall back: sublane-aligned tile near the target; last block ragged
    # (masked stores on one grid step only).
    return min(rows_total, aligned_target)


def sogmoid(x, *, target_block_bytes=None):
    """Elementwise sigmoid via a Pallas TPU kernel. Works for any shape."""
    orig_shape = x.shape
    dtype = x.dtype
    if not jnp.issubdtype(dtype, jnp.floating):
        # 1/(1+exp(-x)) is real-valued; promote integer inputs to f32.
        x = x.astype(jnp.float32)
        dtype = jnp.float32

    n = x.size
    if n == 0:
        return jnp.zeros(orig_shape, dtype)

    block_bytes, vmem_limit, num_tc = _hw_config()
    if target_block_bytes is not None:
        block_bytes = target_block_bytes

    itemsize = jnp.dtype(dtype).itemsize
    # sublane packing: 8 rows for 4-byte, 16 for 2-byte, 32 for 1-byte dtypes
    sublane = max(8, 32 // max(itemsize, 1))

    x_flat = jnp.ravel(x)                      # free for contiguous inputs

    # 128-aligned prefix goes through the Pallas kernel; any <128-element tail
    # is computed with plain jnp (no full-array pad / output-slice round trip).
    n_main = (n // 128) * 128
    if n_main == 0:
        y = 0.5 * (jnp.tanh(0.5 * x_flat) + 1.0)
        return y.astype(dtype).reshape(orig_shape)

    lanes = _pick_lanes(n_main)
    rows_total = n_main // lanes
    main_flat = x_flat if n_main == n else x_flat[:n_main]
    x2d = main_flat.reshape(rows_total, lanes)

    bytes_per_row = lanes * itemsize
    tile_rows = _pick_tile_rows(rows_total, bytes_per_row, block_bytes,
                                sublane, num_tc)
    tile_rows = min(tile_rows, rows_total)
    num_blocks = pl.cdiv(rows_total, tile_rows)

    if num_tc > 1 and num_blocks >= num_tc:
        # Only CORE_PARALLEL actually shards the grid across v7x's 2 TCs.
        dim_sem = (pltpu.CORE_PARALLEL,)
    else:
        dim_sem = ("parallel",)

    out2d = pl.pallas_call(
        _sigmoid_kernel,
        out_shape=jax.ShapeDtypeStruct((rows_total, lanes), dtype),
        grid=(num_blocks,),
        in_specs=[pl.BlockSpec((tile_rows, lanes), lambda i: (i, 0))],
        out_specs=pl.BlockSpec((tile_rows, lanes), lambda i: (i, 0)),
        compiler_params=pltpu.CompilerParams(
            dimension_semantics=dim_sem,
            vmem_limit_bytes=vmem_limit,
        ),
    )(x2d)

    out_main = out2d.reshape(-1)
    if n_main != n:
        # TODO(synk): for bandwidth-critical ragged shapes, handle the tail
        # in-kernel (scalar-prefetched length + masked store) to avoid the
        # concat pass; the tail itself is <128 elements so this is minor.
        tail = x_flat[n_main:]
        tail_out = (0.5 * (jnp.tanh(0.5 * tail) + 1.0)).astype(dtype)
        out_flat = jnp.concatenate([out_main, tail_out])
        return out_flat.reshape(orig_shape)
    return out_main.reshape(orig_shape)


if __name__ == "__main__":
    key = jax.random.PRNGKey(0)
    x = jax.random.normal(key, (2, 4, 16, 16), dtype=jnp.float32)

    y = sogmoid(x)
    jax.block_until_ready(y)

    # sanity check vs plain JAX reference
    y_ref = 1.0 / (1.0 + jnp.exp(-x))
    assert y.shape == x.shape and y.dtype == x.dtype
    assert jnp.max(jnp.abs(y - y_ref)) < 1e-6

    # also exercise the ragged (n % 128 != 0) path
    x2 = jax.random.normal(jax.random.PRNGKey(1), (5, 77), dtype=jnp.float32)
    y2 = sogmoid(x2)
    jax.block_until_ready(y2)
    y2_ref = 1.0 / (1.0 + jnp.exp(-x2))
    assert y2.shape == x2.shape and jnp.max(jnp.abs(y2 - y2_ref)) < 1e-6

    print("KERNEL_OK")
</pallas_src>

<mosaic_0001>
module attributes {stable_mosaic.version = 11 : i64} {
  func.func @_sigmoid_kernel(%arg0: i32, %arg1: memref<1x2048xf32, #tpu.memory_space<vmem>>, %arg2: memref<1x2048xf32, #tpu.memory_space<vmem>>) attributes {dimension_semantics = [#tpu.dimension_semantics<parallel>], iteration_bounds = array<i64: 1>, scalar_prefetch = 0 : i64, scratch_operands = 0 : i64, tpu.core_type = #tpu.core_type<tc>, window_params = [{transform_indices = @transform_0, window_bounds = array<i64: 1, 2048>}, {transform_indices = @transform_1, window_bounds = array<i64: 1, 2048>}]} {
    %c0 = arith.constant 0 : index
    %c0_0 = arith.constant 0 : index
    %0 = vector.load %arg1[%c0, %c0_0] : memref<1x2048xf32, #tpu.memory_space<vmem>>, vector<1x2048xf32>
    %cst = arith.constant 5.000000e-01 : f32
    %1 = vector.broadcast %cst : f32 to vector<1x2048xf32>
    %2 = arith.mulf %1, %0 : vector<1x2048xf32>
    %3 = math.tanh %2 : vector<1x2048xf32>
    %cst_1 = arith.constant 1.000000e+00 : f32
    %4 = vector.broadcast %cst_1 : f32 to vector<1x2048xf32>
    %5 = arith.addf %3, %4 : vector<1x2048xf32>
    %cst_2 = arith.constant 5.000000e-01 : f32
    %6 = vector.broadcast %cst_2 : f32 to vector<1x2048xf32>
    %7 = arith.mulf %6, %5 : vector<1x2048xf32>
    %c0_3 = arith.constant 0 : index
    %c0_4 = arith.constant 0 : index
    %8 = vector.load %arg2[%c0_3, %c0_4] : memref<1x2048xf32, #tpu.memory_space<vmem>>, vector<1x2048xf32>
    tpu.vector_store %arg2[%c0_3, %c0_4], %7 {strides = array<i32>} : memref<1x2048xf32, #tpu.memory_space<vmem>>, vector<1x2048xf32>,
    return
  }
  func.func @transform_0(%arg0: i32) -> (i32, i32) {
    %c0_i32 = arith.constant 0 : i32
    %c0_i32_0 = arith.constant 0 : i32
    return %arg0, %c0_i32 : i32, i32
  }
  func.func @transform_1(%arg0: i32) -> (i32, i32) {
    %c0_i32 = arith.constant 0 : i32
    %c0_i32_0 = arith.constant 0 : i32
    return %arg0, %c0_i32 : i32, i32
  }
}

</mosaic_0001>

<bundles_post_ra>
// kernel: tpu_custom_call.1
= control target key start
LH: loop header
LB: loop body
LE: loop exit
PB: predicated region body
PF: predicated region fallthrough
CT: control target
= control target key end

     0   :  { %6 = vsyncpa [#allocation3], 0  ;;  %s138_s0 = inlined_call_operand.hbm [shape: f32[1,2048], index: 0, kind: input, shape index: {}]   ;;  %s139_s1 = inlined_call_operand.hbm [shape: f32[1,2048], index: 1, kind: output, shape index: {}]  }
   0x1   :  { %7 = vsyncpa [#allocation4], 0  ;;  %s102_s6 = smov [#allocation2]   ;;  %s54_s10 = scalar_lea.hbm %s138_s0, 256 }
   0x2   :  { %s14_s7 = sshll.u32 %s102_s6, 4  ;;  %p55_p0 = scmp.ne.s32.totalorder %s138_s0, %s54_s10  ;;  %s15_s7 = int_to_ptr.vmem [resolvable:$true] %s14_s7 }
   0x3   :  { %p58_p1 = scmp.lt.u32.totalorder %s54_s10, %s138_s0 }
   0x5   :  { %p60_p2 = pnand %p58_p1, %p55_p0 }
   0x7   :  { %63 = shalt.err (!%p60_p2)
}
   0x8   :  { %s64_s15 = scalar_lea.vmem %s15_s7, 256  ;;  %p69_p4 = scmp.lt.s32.totalorder %s15_s7, %s15_s7 }
   0x9   :  { %p65_p3 = scmp.ne.s32.totalorder %s15_s7, %s64_s15  ;;  %p70_p5 = scmp.lt.s32.totalorder %s64_s15, %s64_s15 }
   0xb   :  { %p71_p6 = por %p70_p5, %p69_p4 }
   0xd   :  { %p72_p7 = pnand %p71_p6, %p65_p3 }
   0xf   :  { %75 = shalt.err (!%p72_p7)
}
  0x10   :  { %17 = dma.hbm_to_vmem [thread:$0]  %s138_s0, 256, %s15_s7, [#allocation3]  }
  0x11   :  { %98 = dma.done.wait [#allocation3], 256  }
  0x12   :  { %99 = vsyncadd [#allocation3], 4294967040  ;;  %v21_v0 = vld [vmem:[#allocation2] sm:$0xff]  ;;  %v22_v1 = vld [vmem:[#allocation2 + $0x8] sm:$0xff]  ;;  %s103_s18 = smov [#allocation5]  }
  0x13   :  { %v23_v2 = vmul.f32 0.5, %v21_v0  ;;  %v24_v3 = vmul.f32 0.5, %v22_v1  ;;  %s39_s19 = sshll.u32 %s103_s18, 4  ;;  %s40_s19 = int_to_ptr.vmem [resolvable:$true] %s39_s19 }
  0x14   :  { %s76_s0 = scalar_lea.vmem %s40_s19, 256  ;;  %p81_p9 = scmp.lt.s32.totalorder %s40_s19, %s40_s19 }
  0x15   :  { %50 = vtanh.f32 %v23_v2  ;;  %p77_p8 = scmp.ne.s32.totalorder %s40_s19, %s76_s0  ;;  %p82_p10 = scmp.lt.s32.totalorder %s76_s0, %s76_s0 }
  0x16   :  { %52 = vtanh.f32 %v24_v3 }
  0x17   :  { %p83_p11 = por %p82_p10, %p81_p9 }
  0x19   :  { %p84_p12 = pnand %p83_p11, %p77_p8 }
  0x1f   :  { %v51_v4 = vpop.eup %50 }
  0x20   :  { %v53_v5 = vpop.eup %52  ;;  %v27_v6 = vadd.f32 1.0, %v51_v4 }
  0x21   :  { %v28_v7 = vadd.f32 1.0, %v53_v5 }
  0x22   :  { %v29_v8 = vmul.f32 0.5, %v27_v6 }
  0x23   :  { %v30_v9 = vmul.f32 0.5, %v28_v7 }
  0x24   :  { %31 = vst [vmem:[#allocation5] sm:$0xff] %v29_v8 }
  0x25   :  { %32 = vst [vmem:[#allocation5 + $0x8] sm:$0xff] %v30_v9 }
  0x26   :  { %87 = shalt.err (!%p84_p12)
}
  0x27   :  { %s88_s22 = scalar_lea.hbm %s139_s1, 256 }
  0x28   :  { %p89_p13 = scmp.ne.s32.totalorder %s139_s1, %s88_s22  ;;  %p92_p0 = scmp.lt.u32.totalorder %s88_s22, %s139_s1 }
  0x2a   :  { %p94_p1 = pnand %p92_p0, %p89_p13 }
  0x2c   :  { %97 = shalt.err (!%p94_p1)
}
  0x2d   :  { %42 = dma.vmem_to_hbm [thread:$0]  %s40_s19, 256, %s139_s1, [#allocation4]  }
  0x2e   :  { %100 = dma.done.wait [#allocation4], 256  }
  0x2f   :  { %101 = vsyncadd [#allocation4], 4294967040 }
  0x30   :  { %46 = vsyncpa [#allocation3], 1 }
  0x31   :  { %47 = vsyncpa [#allocation4], 1 }

</bundles_post_ra>
